<compile_context>
chip_gen: v5e
topology: v5e:2x2
jax: 0.10.0
libtpu: 0.0.40
codegen_flags: <defaults>
</compile_context>

<pallas_src>
import functools

import jax
import jax.numpy as jnp
from jax import lax
from jax.experimental import pallas as pl
from jax.experimental.pallas import tpu as pltpu

_MIB = 1024 * 1024


def _vmem_capacity_bytes():
    """Best-effort physical VMEM size; conservative (v7x-like) fallback."""
    try:
        cap = int(pltpu.get_tpu_info().vmem_capacity_bytes)
        if cap > 0:
            return cap
    except Exception:
        pass
    return 64 * _MIB


def _round_up(v, m):
    return ((v + m - 1) // m) * m


# ---------------------------------------------------------------------------
# Fused path: one grid step handles a block of batch elements end to end.
# ---------------------------------------------------------------------------
def _dyrelu_fused_kernel(x_ref, w1_ref, b1_ref, w2s_ref, b2s_ref, o_ref,
                         *, inv_hw, lambda_a, init_a, init_b):
    x = x_ref[...]                                         # (bt, C, HW), native dtype

    # Global average pool over the full (unpadded) spatial lane axis; f32 accum.
    y = jnp.sum(x, axis=-1, dtype=jnp.float32) * inv_hw    # (bt, C)

    # fc1 -> ReLU
    h = jnp.dot(y, w1_ref[...], preferred_element_type=jnp.float32) + b1_ref[...]
    h = jnp.maximum(h, 0.0)                                 # (bt, SQ)

    # fc2, pre-split per coefficient head (lane-dense (bt, C) results)
    def head(k):
        z = jnp.dot(h, w2s_ref[k], preferred_element_type=jnp.float32) + b2s_ref[k]
        return jnp.clip(z + 3.0, 0.0, 6.0) * (1.0 / 6.0)    # h_sigmoid

    # torch.split order along the 4C axis is a1, b1, a2, b2
    a1 = (head(0) - 0.5) * lambda_a + init_a[0]
    b1c = head(1) - 0.5 + init_b[0]
    a2 = (head(2) - 0.5) * lambda_a + init_a[1]
    b2c = head(3) - 0.5 + init_b[1]

    cdt = x.dtype  # apply in the input dtype (halves VALU/vreg traffic for bf16)
    a1 = a1.astype(cdt)[:, :, None]
    b1c = b1c.astype(cdt)[:, :, None]
    a2 = a2.astype(cdt)[:, :, None]
    b2c = b2c.astype(cdt)[:, :, None]

    o_ref[...] = jnp.maximum(x * a1 + b1c, x * a2 + b2c).astype(o_ref.dtype)


# ---------------------------------------------------------------------------
# Split path (huge per-batch slabs): coefficient kernel + apply kernel.
# ---------------------------------------------------------------------------
def _dyrelu_coef_kernel(x_ref, w1_ref, b1_ref, w2s_ref, b2s_ref, coef_ref, acc_ref,
                        *, hw, st, inv_hw, lambda_a, init_a, init_b):
    s = pl.program_id(1)

    @pl.when(s == 0)
    def _():
        acc_ref[...] = jnp.zeros_like(acc_ref)

    x = x_ref[...]                                          # (1, C, st)
    # Mask the ragged spatial tail so out-of-bounds lanes never enter the pool.
    lane = lax.broadcasted_iota(jnp.int32, (1, 1, x.shape[-1]), 2) + s * st
    xm = jnp.where(lane < hw, x.astype(jnp.float32), 0.0)
    acc_ref[...] += jnp.sum(xm, axis=-1)                    # (1, C) f32

    @pl.when(s == pl.num_programs(1) - 1)
    def _():
        y = acc_ref[...] * inv_hw                           # (1, C)
        h = jnp.dot(y, w1_ref[...], preferred_element_type=jnp.float32) + b1_ref[...]
        h = jnp.maximum(h, 0.0)

        def head(k):
            z = jnp.dot(h, w2s_ref[k], preferred_element_type=jnp.float32) + b2s_ref[k]
            return jnp.clip(z + 3.0, 0.0, 6.0) * (1.0 / 6.0)

        coef_ref[:, 0, :] = (head(0) - 0.5) * lambda_a + init_a[0]
        coef_ref[:, 1, :] = head(1) - 0.5 + init_b[0]
        coef_ref[:, 2, :] = (head(2) - 0.5) * lambda_a + init_a[1]
        coef_ref[:, 3, :] = head(3) - 0.5 + init_b[1]


def _dyrelu_apply_kernel(coef_ref, x_ref, o_ref):
    x = x_ref[...]                                          # (1, C, st)
    cdt = x.dtype
    a1 = coef_ref[:, 0, :].astype(cdt)[:, :, None]
    b1c = coef_ref[:, 1, :].astype(cdt)[:, :, None]
    a2 = coef_ref[:, 2, :].astype(cdt)[:, :, None]
    b2c = coef_ref[:, 3, :].astype(cdt)[:, :, None]
    o_ref[...] = jnp.maximum(x * a1 + b1c, x * a2 + b2c).astype(o_ref.dtype)


# ---------------------------------------------------------------------------
# Wrapper
# ---------------------------------------------------------------------------
def dyrelu_pallas(x, w1, b1, w2, b2, *, lambda_a=2.0,
                  init_a=(1.0, 0.0), init_b=(0.0, 0.0),
                  force_split=False, split_spatial_tile=None):
    """x: (B, C, H, W) (NCHW).  w1:(C,SQ) b1:(SQ,) w2:(SQ,4C) b2:(4C,)."""
    B, C, H, W = x.shape
    HW = H * W
    SQ = w1.shape[1]
    assert w1.shape == (C, SQ)
    assert w2.shape == (SQ, 4 * C)
    assert b2.shape == (4 * C,)

    itemsize = jnp.dtype(x.dtype).itemsize
    x_flat = x.reshape(B, C, HW)            # no spatial padding (no extra HBM passes)
    b1_2d = b1.reshape(1, SQ)
    # Split fc2 into the four coefficient heads wrapper-side so the kernel never
    # slices the 4C lane axis at non-128 offsets.
    w2s = jnp.stack([w2[:, k * C:(k + 1) * C] for k in range(4)], axis=0)   # (4,SQ,C)
    b2s = b2.reshape(4, 1, C)                                               # (4,1,C)

    # --- generation-aware VMEM budgeting -----------------------------------
    vmem_cap = _vmem_capacity_bytes()
    if vmem_cap <= 64 * _MIB:       # v7x-like: 64 MiB VMEM, 2 TensorCores
        budget, limit_cap, multi_tc = 20 * _MIB, 32 * _MIB, True
    else:                           # v5e / v6e: 128 MiB VMEM, 1 TensorCore
        budget, limit_cap, multi_tc = 56 * _MIB, 96 * _MIB, False

    weight_bytes = (w1.size + b1_2d.size + w2s.size + b2s.size) * 4
    fixed_bytes = 2 * weight_bytes + 2 * _MIB          # double-buffered weights + slack

    slab = C * HW * itemsize                            # one batch row, one direction
    # in+out double-buffered blocks + generous room for in-kernel f32 temporaries
    per_bt_need = 4 * slab + 2 * C * HW * 4

    statics = dict(inv_hw=1.0 / HW, lambda_a=float(lambda_a),
                   init_a=tuple(float(v) for v in init_a),
                   init_b=tuple(float(v) for v in init_b))

    fused_ok = (not force_split) and (per_bt_need + fixed_bytes <= limit_cap)

    if fused_ok:
        bt = min(B,
                 max(1, budget // (4 * slab)),
                 max(1, (limit_cap - fixed_bytes) // per_bt_need))
        if multi_tc and B >= 2:
            bt = min(bt, -(-B // 2))     # >= 2 grid steps so both TCs get work
        grid = (pl.cdiv(B, bt),)         # non-divisor bt -> ragged last block (ok)
        vmem_limit = int(min(limit_cap,
                             max(4 * _MIB, bt * per_bt_need + fixed_bytes)))

        kernel = functools.partial(_dyrelu_fused_kernel, **statics)
        out_flat = pl.pallas_call(
            kernel,
            out_shape=jax.ShapeDtypeStruct((B, C, HW), x.dtype),
            grid_spec=pltpu.PrefetchScalarGridSpec(
                num_scalar_prefetch=0,
                grid=grid,
                in_specs=[
                    pl.BlockSpec((bt, C, HW), lambda i: (i, 0, 0)),   # x block
                    pl.BlockSpec((C, SQ), lambda i: (0, 0)),          # fc1 weight
                    pl.BlockSpec((1, SQ), lambda i: (0, 0)),          # fc1 bias
                    pl.BlockSpec((4, SQ, C), lambda i: (0, 0, 0)),    # fc2 weights
                    pl.BlockSpec((4, 1, C), lambda i: (0, 0, 0)),     # fc2 biases
                ],
                out_specs=pl.BlockSpec((bt, C, HW), lambda i: (i, 0, 0)),
            ),
            compiler_params=pltpu.CompilerParams(
                dimension_semantics=("parallel",),
                vmem_limit_bytes=vmem_limit),
        )(x_flat, w1, b1_2d, w2s, b2s)
        return out_flat.reshape(B, C, H, W)

    # --- split path: pool/fc coefficient kernel + elementwise apply kernel ---
    hw_up = _round_up(HW, 128)
    if split_spatial_tile is not None:
        st = max(128, (int(split_spatial_tile) // 128) * 128)
    else:
        st = min(budget // (4 * C * itemsize),
                 (limit_cap - fixed_bytes) // (6 * C * itemsize))
        st = max(128, (st // 128) * 128)
    st = min(st, hw_up)
    if st >= HW:
        st = HW                         # full-dim block is always legal
    n_st = pl.cdiv(HW, st)

    xblk = C * st * itemsize
    vmem_limit_coef = int(min(limit_cap,
                              max(4 * _MIB, 3 * xblk + C * st * 4 + fixed_bytes)))
    vmem_limit_apply = int(min(limit_cap, max(4 * _MIB, 6 * xblk + fixed_bytes)))

    coef_kernel = functools.partial(_dyrelu_coef_kernel, hw=HW, st=st, **statics)
    coef = pl.pallas_call(
        coef_kernel,
        out_shape=jax.ShapeDtypeStruct((B, 4, C), jnp.float32),
        grid_spec=pltpu.PrefetchScalarGridSpec(
            num_scalar_prefetch=0,
            grid=(B, n_st),
            in_specs=[
                pl.BlockSpec((1, C, st), lambda b, s: (b, 0, s)),
                pl.BlockSpec((C, SQ), lambda b, s: (0, 0)),
                pl.BlockSpec((1, SQ), lambda b, s: (0, 0)),
                pl.BlockSpec((4, SQ, C), lambda b, s: (0, 0, 0)),
                pl.BlockSpec((4, 1, C), lambda b, s: (0, 0, 0)),
            ],
            out_specs=pl.BlockSpec((1, 4, C), lambda b, s: (b, 0, 0)),
            scratch_shapes=[pltpu.VMEM((1, C), jnp.float32)],
        ),
        compiler_params=pltpu.CompilerParams(
            dimension_semantics=("parallel", "arbitrary"),
            vmem_limit_bytes=vmem_limit_coef),
    )(x_flat, w1, b1_2d, w2s, b2s)

    out_flat = pl.pallas_call(
        _dyrelu_apply_kernel,
        out_shape=jax.ShapeDtypeStruct((B, C, HW), x.dtype),
        grid_spec=pltpu.PrefetchScalarGridSpec(
            num_scalar_prefetch=0,
            grid=(B, n_st),
            in_specs=[
                pl.BlockSpec((1, 4, C), lambda b, s: (b, 0, 0)),     # coefficients
                pl.BlockSpec((1, C, st), lambda b, s: (b, 0, s)),    # x tile
            ],
            out_specs=pl.BlockSpec((1, C, st), lambda b, s: (b, 0, s)),
        ),
        compiler_params=pltpu.CompilerParams(
            dimension_semantics=("parallel", "parallel"),
            vmem_limit_bytes=vmem_limit_apply),
    )(coef, x_flat)
    return out_flat.reshape(B, C, H, W)


def dyrelu_reference(x, w1, b1, w2, b2, *, lambda_a=2.0,
                     init_a=(1.0, 0.0), init_b=(0.0, 0.0)):
    """Plain-JAX reference mirroring the PyTorch forward (exp=4 path)."""
    y = jnp.mean(x, axis=(2, 3))                             # (B, C)
    h = jnp.maximum(y @ w1 + b1, 0.0)                        # (B, SQ)
    coef = jnp.clip(h @ w2 + b2 + 3.0, 0.0, 6.0) / 6.0       # (B, 4C) h_sigmoid
    a1, b1c, a2, b2c = jnp.split(coef, 4, axis=1)
    a1 = (a1 - 0.5) * lambda_a + init_a[0]
    a2 = (a2 - 0.5) * lambda_a + init_a[1]
    b1c = b1c - 0.5 + init_b[0]
    b2c = b2c - 0.5 + init_b[1]
    a1 = a1[:, :, None, None]
    a2 = a2[:, :, None, None]
    b1c = b1c[:, :, None, None]
    b2c = b2c[:, :, None, None]
    return jnp.maximum(x * a1 + b1c, x * a2 + b2c)


if __name__ == "__main__":
    # Module config: DYReLU(inp=C, oup=C, reduction=4, K2=True, use_bias=True)
    #   -> exp = 4, squeeze = C // 4, lambda_a = 1.0 * 2 = 2.0
    # TODO(synk): use_spatial=True branch (1x1 Conv + BatchNorm gate) not
    # implemented; it is disabled in the default config.
    def make_inputs(key, B, C, H, W):
        SQ = C // 4
        kx, kw1, kb1, kw2, kb2 = jax.random.split(key, 5)
        x = jax.random.normal(kx, (B, C, H, W), dtype=jnp.float32)
        w1 = jax.random.normal(kw1, (C, SQ), dtype=jnp.float32) * 0.1   # (in, out)
        b1 = jax.random.normal(kb1, (SQ,), dtype=jnp.float32) * 0.1
        w2 = jax.random.normal(kw2, (SQ, 4 * C), dtype=jnp.float32) * 0.1
        b2 = jax.random.normal(kb2, (4 * C,), dtype=jnp.float32) * 0.1
        return x, w1, b1, w2, b2

    configs = [
        # fused path, HW a multiple of 128
        ((4, 16, 16, 16), dict()),
        # fused path, HW=196 (no padding needed) and ragged last batch block
        ((3, 16, 14, 14), dict()),
        # split (coef + apply) path: masked pool accumulation over 5 spatial tiles
        ((2, 16, 24, 24), dict(force_split=True, split_spatial_tile=128)),
    ]

    keys = jax.random.split(jax.random.PRNGKey(0), len(configs))
    for key_i, ((B, C, H, W), kw) in zip(keys, configs):
        x, w1, b1, w2, b2 = make_inputs(key_i, B, C, H, W)
        out = jax.block_until_ready(dyrelu_pallas(x, w1, b1, w2, b2, **kw))
        ref = dyrelu_reference(x, w1, b1, w2, b2)
        assert out.shape == (B, C, H, W)
        assert jnp.allclose(out, ref, atol=1e-5, rtol=1e-5), f"mismatch for {(B, C, H, W)}"

    print("KERNEL_OK")
</pallas_src>

<mosaic_0001>
module attributes {stable_mosaic.version = 11 : i64} {
  func.func @_dyrelu_fused_kernel(%arg0: i32, %arg1: memref<2x16x256xf32, #tpu.memory_space<vmem>>, %arg2: memref<16x4xf32, #tpu.memory_space<vmem>>, %arg3: memref<1x4xf32, #tpu.memory_space<vmem>>, %arg4: memref<4x4x16xf32, #tpu.memory_space<vmem>>, %arg5: memref<4x1x16xf32, #tpu.memory_space<vmem>>, %arg6: memref<2x16x256xf32, #tpu.memory_space<vmem>>) attributes {dimension_semantics = [#tpu.dimension_semantics<parallel>], iteration_bounds = array<i64: 2>, scalar_prefetch = 0 : i64, scratch_operands = 0 : i64, tpu.core_type = #tpu.core_type<tc>, window_params = [{transform_indices = @transform_0, window_bounds = array<i64: 2, 16, 256>}, {pipeline_mode = #tpu.pipeline_mode<synchronous>, transform_indices = @transform_1, window_bounds = array<i64: 16, 4>}, {pipeline_mode = #tpu.pipeline_mode<synchronous>, transform_indices = @transform_2, window_bounds = array<i64: 1, 4>}, {pipeline_mode = #tpu.pipeline_mode<synchronous>, transform_indices = @transform_3, window_bounds = array<i64: 4, 4, 16>}, {pipeline_mode = #tpu.pipeline_mode<synchronous>, transform_indices = @transform_4, window_bounds = array<i64: 4, 1, 16>}, {transform_indices = @transform_5, window_bounds = array<i64: 2, 16, 256>}]} {
    %c0 = arith.constant 0 : index
    %c0_0 = arith.constant 0 : index
    %c0_1 = arith.constant 0 : index
    %0 = vector.load %arg1[%c0, %c0_0, %c0_1] : memref<2x16x256xf32, #tpu.memory_space<vmem>>, vector<2x16x256xf32>
    %cst = arith.constant dense<0.000000e+00> : vector<2x16xf32>
    %1 = vector.multi_reduction <add>, %0, %cst [2] : vector<2x16x256xf32> to vector<2x16xf32>
    %cst_2 = arith.constant 3.906250e-03 : f32
    %2 = vector.broadcast %cst_2 : f32 to vector<2x16xf32>
    %3 = arith.mulf %1, %2 : vector<2x16xf32>
    %c0_3 = arith.constant 0 : index
    %c0_4 = arith.constant 0 : index
    %4 = vector.load %arg2[%c0_3, %c0_4] : memref<16x4xf32, #tpu.memory_space<vmem>>, vector<16x4xf32>
    %cst_5 = arith.constant dense<0.000000e+00> : vector<2x4xf32>
    %5 = tpu.matmul %3, %4, %cst_5 {dimension_numbers = #tpu.dot_dimension_numbers<[1], [0], [0], [1], [0, 0, 1, 1], [], []>} : vector<2x16xf32>, vector<16x4xf32>, vector<2x4xf32> -> vector<2x4xf32>
    %c0_6 = arith.constant 0 : index
    %c0_7 = arith.constant 0 : index
    %6 = vector.load %arg3[%c0_6, %c0_7] : memref<1x4xf32, #tpu.memory_space<vmem>>, vector<1x4xf32>
    %7 = vector.broadcast %6 : vector<1x4xf32> to vector<2x4xf32>
    %8 = arith.addf %5, %7 : vector<2x4xf32>
    %cst_8 = arith.constant 0.000000e+00 : f32
    %9 = vector.broadcast %cst_8 : f32 to vector<2x4xf32>
    %10 = arith.maximumf %8, %9 : vector<2x4xf32>
    %c0_9 = arith.constant 0 : index
    %c0_10 = arith.constant 0 : index
    %c0_11 = arith.constant 0 : index
    %11 = vector.load %arg4[%c0_9, %c0_10, %c0_11] : memref<4x4x16xf32, #tpu.memory_space<vmem>>, vector<1x4x16xf32>
    %12 = vector.shape_cast %11 : vector<1x4x16xf32> to vector<4x16xf32>
    %cst_12 = arith.constant dense<0.000000e+00> : vector<2x16xf32>
    %13 = tpu.matmul %10, %12, %cst_12 {dimension_numbers = #tpu.dot_dimension_numbers<[1], [0], [0], [1], [0, 0, 1, 1], [], []>} : vector<2x4xf32>, vector<4x16xf32>, vector<2x16xf32> -> vector<2x16xf32>
    %c0_13 = arith.constant 0 : index
    %c0_14 = arith.constant 0 : index
    %c0_15 = arith.constant 0 : index
    %14 = vector.load %arg5[%c0_13, %c0_14, %c0_15] : memref<4x1x16xf32, #tpu.memory_space<vmem>>, vector<1x1x16xf32>
    %15 = vector.shape_cast %14 : vector<1x1x16xf32> to vector<1x16xf32>
    %16 = vector.broadcast %15 : vector<1x16xf32> to vector<2x16xf32>
    %17 = arith.addf %13, %16 : vector<2x16xf32>
    %cst_16 = arith.constant 3.000000e+00 : f32
    %18 = vector.broadcast %cst_16 : f32 to vector<2x16xf32>
    %19 = arith.addf %17, %18 : vector<2x16xf32>
    %cst_17 = arith.constant 0.000000e+00 : f32
    %cst_18 = arith.constant 6.000000e+00 : f32
    %20 = vector.broadcast %cst_17 : f32 to vector<2x16xf32>
    %21 = arith.maximumf %20, %19 : vector<2x16xf32>
    %22 = vector.broadcast %cst_18 : f32 to vector<2x16xf32>
    %23 = arith.minimumf %22, %21 : vector<2x16xf32>
    %cst_19 = arith.constant 0.166666672 : f32
    %24 = vector.broadcast %cst_19 : f32 to vector<2x16xf32>
    %25 = arith.mulf %23, %24 : vector<2x16xf32>
    %cst_20 = arith.constant 5.000000e-01 : f32
    %26 = vector.broadcast %cst_20 : f32 to vector<2x16xf32>
    %27 = arith.subf %25, %26 : vector<2x16xf32>
    %cst_21 = arith.constant 2.000000e+00 : f32
    %28 = vector.broadcast %cst_21 : f32 to vector<2x16xf32>
    %29 = arith.mulf %27, %28 : vector<2x16xf32>
    %cst_22 = arith.constant 1.000000e+00 : f32
    %30 = vector.broadcast %cst_22 : f32 to vector<2x16xf32>
    %31 = arith.addf %29, %30 : vector<2x16xf32>
    %c1 = arith.constant 1 : index
    %c0_23 = arith.constant 0 : index
    %c0_24 = arith.constant 0 : index
    %32 = vector.load %arg4[%c1, %c0_23, %c0_24] : memref<4x4x16xf32, #tpu.memory_space<vmem>>, vector<1x4x16xf32>
    %33 = vector.shape_cast %32 : vector<1x4x16xf32> to vector<4x16xf32>
    %cst_25 = arith.constant dense<0.000000e+00> : vector<2x16xf32>
    %34 = tpu.matmul %10, %33, %cst_25 {dimension_numbers = #tpu.dot_dimension_numbers<[1], [0], [0], [1], [0, 0, 1, 1], [], []>} : vector<2x4xf32>, vector<4x16xf32>, vector<2x16xf32> -> vector<2x16xf32>
    %c1_26 = arith.constant 1 : index
    %c0_27 = arith.constant 0 : index
    %c0_28 = arith.constant 0 : index
    %35 = vector.load %arg5[%c1_26, %c0_27, %c0_28] : memref<4x1x16xf32, #tpu.memory_space<vmem>>, vector<1x1x16xf32>
    %36 = vector.shape_cast %35 : vector<1x1x16xf32> to vector<1x16xf32>
    %37 = vector.broadcast %36 : vector<1x16xf32> to vector<2x16xf32>
    %38 = arith.addf %34, %37 : vector<2x16xf32>
    %cst_29 = arith.constant 3.000000e+00 : f32
    %39 = vector.broadcast %cst_29 : f32 to vector<2x16xf32>
    %40 = arith.addf %38, %39 : vector<2x16xf32>
    %cst_30 = arith.constant 0.000000e+00 : f32
    %cst_31 = arith.constant 6.000000e+00 : f32
    %41 = vector.broadcast %cst_30 : f32 to vector<2x16xf32>
    %42 = arith.maximumf %41, %40 : vector<2x16xf32>
    %43 = vector.broadcast %cst_31 : f32 to vector<2x16xf32>
    %44 = arith.minimumf %43, %42 : vector<2x16xf32>
    %cst_32 = arith.constant 0.166666672 : f32
    %45 = vector.broadcast %cst_32 : f32 to vector<2x16xf32>
    %46 = arith.mulf %44, %45 : vector<2x16xf32>
    %cst_33 = arith.constant 5.000000e-01 : f32
    %47 = vector.broadcast %cst_33 : f32 to vector<2x16xf32>
    %48 = arith.subf %46, %47 : vector<2x16xf32>
    %cst_34 = arith.constant 0.000000e+00 : f32
    %49 = vector.broadcast %cst_34 : f32 to vector<2x16xf32>
    %50 = arith.addf %48, %49 : vector<2x16xf32>
    %c2 = arith.constant 2 : index
    %c0_35 = arith.constant 0 : index
    %c0_36 = arith.constant 0 : index
    %51 = vector.load %arg4[%c2, %c0_35, %c0_36] : memref<4x4x16xf32, #tpu.memory_space<vmem>>, vector<1x4x16xf32>
    %52 = vector.shape_cast %51 : vector<1x4x16xf32> to vector<4x16xf32>
    %cst_37 = arith.constant dense<0.000000e+00> : vector<2x16xf32>
    %53 = tpu.matmul %10, %52, %cst_37 {dimension_numbers = #tpu.dot_dimension_numbers<[1], [0], [0], [1], [0, 0, 1, 1], [], []>} : vector<2x4xf32>, vector<4x16xf32>, vector<2x16xf32> -> vector<2x16xf32>
    %c2_38 = arith.constant 2 : index
    %c0_39 = arith.constant 0 : index
    %c0_40 = arith.constant 0 : index
    %54 = vector.load %arg5[%c2_38, %c0_39, %c0_40] : memref<4x1x16xf32, #tpu.memory_space<vmem>>, vector<1x1x16xf32>
    %55 = vector.shape_cast %54 : vector<1x1x16xf32> to vector<1x16xf32>
    %56 = vector.broadcast %55 : vector<1x16xf32> to vector<2x16xf32>
    %57 = arith.addf %53, %56 : vector<2x16xf32>
    %cst_41 = arith.constant 3.000000e+00 : f32
    %58 = vector.broadcast %cst_41 : f32 to vector<2x16xf32>
    %59 = arith.addf %57, %58 : vector<2x16xf32>
    %cst_42 = arith.constant 0.000000e+00 : f32
    %cst_43 = arith.constant 6.000000e+00 : f32
    %60 = vector.broadcast %cst_42 : f32 to vector<2x16xf32>
    %61 = arith.maximumf %60, %59 : vector<2x16xf32>
    %62 = vector.broadcast %cst_43 : f32 to vector<2x16xf32>
    %63 = arith.minimumf %62, %61 : vector<2x16xf32>
    %cst_44 = arith.constant 0.166666672 : f32
    %64 = vector.broadcast %cst_44 : f32 to vector<2x16xf32>
    %65 = arith.mulf %63, %64 : vector<2x16xf32>
    %cst_45 = arith.constant 5.000000e-01 : f32
    %66 = vector.broadcast %cst_45 : f32 to vector<2x16xf32>
    %67 = arith.subf %65, %66 : vector<2x16xf32>
    %cst_46 = arith.constant 2.000000e+00 : f32
    %68 = vector.broadcast %cst_46 : f32 to vector<2x16xf32>
    %69 = arith.mulf %67, %68 : vector<2x16xf32>
    %cst_47 = arith.constant 0.000000e+00 : f32
    %70 = vector.broadcast %cst_47 : f32 to vector<2x16xf32>
    %71 = arith.addf %69, %70 : vector<2x16xf32>
    %c3 = arith.constant 3 : index
    %c0_48 = arith.constant 0 : index
    %c0_49 = arith.constant 0 : index
    %72 = vector.load %arg4[%c3, %c0_48, %c0_49] : memref<4x4x16xf32, #tpu.memory_space<vmem>>, vector<1x4x16xf32>
    %73 = vector.shape_cast %72 : vector<1x4x16xf32> to vector<4x16xf32>
    %cst_50 = arith.constant dense<0.000000e+00> : vector<2x16xf32>
    %74 = tpu.matmul %10, %73, %cst_50 {dimension_numbers = #tpu.dot_dimension_numbers<[1], [0], [0], [1], [0, 0, 1, 1], [], []>} : vector<2x4xf32>, vector<4x16xf32>, vector<2x16xf32> -> vector<2x16xf32>
    %c3_51 = arith.constant 3 : index
    %c0_52 = arith.constant 0 : index
    %c0_53 = arith.constant 0 : index
    %75 = vector.load %arg5[%c3_51, %c0_52, %c0_53] : memref<4x1x16xf32, #tpu.memory_space<vmem>>, vector<1x1x16xf32>
    %76 = vector.shape_cast %75 : vector<1x1x16xf32> to vector<1x16xf32>
    %77 = vector.broadcast %76 : vector<1x16xf32> to vector<2x16xf32>
    %78 = arith.addf %74, %77 : vector<2x16xf32>
    %cst_54 = arith.constant 3.000000e+00 : f32
    %79 = vector.broadcast %cst_54 : f32 to vector<2x16xf32>
    %80 = arith.addf %78, %79 : vector<2x16xf32>
    %cst_55 = arith.constant 0.000000e+00 : f32
    %cst_56 = arith.constant 6.000000e+00 : f32
    %81 = vector.broadcast %cst_55 : f32 to vector<2x16xf32>
    %82 = arith.maximumf %81, %80 : vector<2x16xf32>
    %83 = vector.broadcast %cst_56 : f32 to vector<2x16xf32>
    %84 = arith.minimumf %83, %82 : vector<2x16xf32>
    %cst_57 = arith.constant 0.166666672 : f32
    %85 = vector.broadcast %cst_57 : f32 to vector<2x16xf32>
    %86 = arith.mulf %84, %85 : vector<2x16xf32>
    %cst_58 = arith.constant 5.000000e-01 : f32
    %87 = vector.broadcast %cst_58 : f32 to vector<2x16xf32>
    %88 = arith.subf %86, %87 : vector<2x16xf32>
    %cst_59 = arith.constant 0.000000e+00 : f32
    %89 = vector.broadcast %cst_59 : f32 to vector<2x16xf32>
    %90 = arith.addf %88, %89 : vector<2x16xf32>
    %91 = vector.shape_cast %31 : vector<2x16xf32> to vector<2x16x1xf32>
    %92 = vector.shape_cast %50 : vector<2x16xf32> to vector<2x16x1xf32>
    %93 = vector.shape_cast %71 : vector<2x16xf32> to vector<2x16x1xf32>
    %94 = vector.shape_cast %90 : vector<2x16xf32> to vector<2x16x1xf32>
    %95 = vector.broadcast %91 : vector<2x16x1xf32> to vector<2x16x256xf32>
    %96 = arith.mulf %0, %95 : vector<2x16x256xf32>
    %97 = vector.broadcast %92 : vector<2x16x1xf32> to vector<2x16x256xf32>
    %98 = arith.addf %96, %97 : vector<2x16x256xf32>
    %99 = vector.broadcast %93 : vector<2x16x1xf32> to vector<2x16x256xf32>
    %100 = arith.mulf %0, %99 : vector<2x16x256xf32>
    %101 = vector.broadcast %94 : vector<2x16x1xf32> to vector<2x16x256xf32>
    %102 = arith.addf %100, %101 : vector<2x16x256xf32>
    %103 = arith.maximumf %98, %102 : vector<2x16x256xf32>
    %c0_60 = arith.constant 0 : index
    %c0_61 = arith.constant 0 : index
    %c0_62 = arith.constant 0 : index
    %104 = vector.load %arg6[%c0_60, %c0_61, %c0_62] : memref<2x16x256xf32, #tpu.memory_space<vmem>>, vector<2x16x256xf32>
    tpu.vector_store %arg6[%c0_60, %c0_61, %c0_62], %103 {strides = array<i32>} : memref<2x16x256xf32, #tpu.memory_space<vmem>>, vector<2x16x256xf32>,
    return
  }
  func.func @transform_0(%arg0: i32) -> (i32, i32, i32) {
    %c0_i32 = arith.constant 0 : i32
    %c0_i32_0 = arith.constant 0 : i32
    %c0_i32_1 = arith.constant 0 : i32
    return %arg0, %c0_i32, %c0_i32_0 : i32, i32, i32
  }
  func.func @transform_1(%arg0: i32) -> (i32, i32) {
    %c0_i32 = arith.constant 0 : i32
    %c0_i32_0 = arith.constant 0 : i32
    %c0_i32_1 = arith.constant 0 : i32
    return %c0_i32, %c0_i32_0 : i32, i32
  }
  func.func @transform_2(%arg0: i32) -> (i32, i32) {
    %c0_i32 = arith.constant 0 : i32
    %c0_i32_0 = arith.constant 0 : i32
    %c0_i32_1 = arith.constant 0 : i32
    return %c0_i32, %c0_i32_0 : i32, i32
  }
  func.func @transform_3(%arg0: i32) -> (i32, i32, i32) {
    %c0_i32 = arith.constant 0 : i32
    %c0_i32_0 = arith.constant 0 : i32
    %c0_i32_1 = arith.constant 0 : i32
    %c0_i32_2 = arith.constant 0 : i32
    return %c0_i32, %c0_i32_0, %c0_i32_1 : i32, i32, i32
  }
  func.func @transform_4(%arg0: i32) -> (i32, i32, i32) {
    %c0_i32 = arith.constant 0 : i32
    %c0_i32_0 = arith.constant 0 : i32
    %c0_i32_1 = arith.constant 0 : i32
    %c0_i32_2 = arith.constant 0 : i32
    return %c0_i32, %c0_i32_0, %c0_i32_1 : i32, i32, i32
  }
  func.func @transform_5(%arg0: i32) -> (i32, i32, i32) {
    %c0_i32 = arith.constant 0 : i32
    %c0_i32_0 = arith.constant 0 : i32
    %c0_i32_1 = arith.constant 0 : i32
    return %arg0, %c0_i32, %c0_i32_0 : i32, i32, i32
  }
}

</mosaic_0001>

<bundles_post_ra>
// kernel: tpu_custom_call.1
= control target key start
LH: loop header
LB: loop body
LE: loop exit
PB: predicated region body
PF: predicated region fallthrough
CT: control target
= control target key end

     0   :  { %10 = vsyncpa [#allocation3], 0  ;;  %s1179_s0 = inlined_call_operand.hbm [shape: f32[4,16,256], index: 0, kind: input, shape index: {}]   ;;  %s1180_s1 = inlined_call_operand.vmem [shape: f32[16,4], index: 1, kind: input, shape index: {}]   ;;  %s1181_s2 = inlined_call_operand.vmem [shape: f32[1,4], index: 2, kind: input, shape index: {}]   ;;  %s1182_s3 = inlined_call_operand.vmem [shape: f32[4,4,16], index: 3, kind: input, shape index: {}]   ;;  %s1183_s4 = inlined_call_operand.vmem [shape: f32[4,1,16], index: 4, kind: input, shape index: {}]   ;;  %s1184_s5 = inlined_call_operand.hbm [shape: f32[4,16,256], index: 5, kind: output, shape index: {}]  }
   0x1   :  { %12 = vsyncpa [#allocation3 + $0x1], 0 }
   0x2   :  { %13 = vsyncpa [#allocation4], 0 }
   0x3   :  { %15 = vsyncpa [#allocation4 + $0x1], 0  ;;  %s947_s18 = smov 0   ;;  %s949_s19 = smov 0  }
   0x4   :  { %s951_s20 = smov 0   ;;  %s953_s21 = smov 0  }
   0x5 LB: > { %s968_s22 = sadd.s32 4294967295, %s911_s21   ;;  %s709_s23 = sadd.s32 4294967294, %s911_s21   ;;  %s911_s21 = sphi %s953_s21, %s1194_s21   ;;  %s907_s20 = sphi %s951_s20, %s1193_s20   ;;  %s903_s19 = sphi %s949_s19, %s1192_s19   ;;  %s899_s18 = sphi %s947_s18, %s1191_s18  }
   0x6   : > { %s972_s24 = sadd.s32 1, %s911_s21   ;;  %s28_s25 = sadd.s32 1, %s907_s20 }
   0x7   : > { %s25_s26 = ssub.s32 %s911_s21, %s972_s24  ;;  %p35_p0 = scmp.ne.s32.totalorder %s907_s20, %s903_s19 }
   0x8   : > { %p26_p1 = scmp.eq.s32.totalorder %s25_s26, 0  ;;  %p36_p2 = scmp.eq.s32.totalorder %s911_s21, 0 }
   0x9   : > { %p41_p3 = scmp.ne.s32.totalorder %s903_s19, %s899_s18  ;;  %p42_p4 = scmp.eq.s32.totalorder %s968_s22, 0 }
   0xa   : > { %s984_s27 = scalar_select %p26_p1, %s907_s20, %s28_s25  }
   0xb   : > { %p986_p5 = por %p36_p2, %p35_p0  ;;  %p990_p6 = por %p42_p4, %p41_p3 }
   0xc   : > { %p149_p7 = scmp.eq.s32.totalorder %s968_s22, 1  ;;  %p155_p8 = scmp.eq.s32.totalorder %s709_s23, 1 }
   0xd   : > { %p760_p10 = scmp.lt.s32.totalorder %s911_s21, 2  ;;  %s187_s7 = sand.u32 1, %s907_s20  }
   0xe   : > { %p997_p11 = por %p149_p7, %p35_p0  ;;  %p1001_p12 = por %p155_p8, %p41_p3 }
   0xf   : > { %s745_s8 = sshll.u32 %s911_s21, 6  ;;  %s712_s9 = sshll.u32 %s187_s7, 6 }
  0x10   : > { %s197_s12 = scalar_lea.hbm %s1179_s0, %s745_s8  ;;  %s191_s14 = scalar_lea.vmem [#allocation2], %s712_s9 }
  0x11   : > { %s198_s13 = sshll.u32 %s197_s12, 4  ;;  %s200_s15 = sshll.u32 %s191_s14, 4  ;;  %s199_s13 = int_to_ptr.hbm [resolvable:$true] %s198_s13  ;;  %s201_s15 = int_to_ptr.vmem [resolvable:$true] %s200_s15 }
  0x12   : > { %p1012_p13 = pnand %p760_p10, %p986_p5  ;;  %p716_p0 = scmp.ge.s32.totalorder %s911_s21, 1 }
  0x13   : > { %p208_p1 = scmp.lt.s32.totalorder %s911_s21, 3  ;;  %s188_s17 = scalar_lea.sflag [#allocation3], %s187_s7 }
  0x14   : > { %s815_s23 = sshra.s32 %s199_s13, 4  ;;  %p819_p3 = pneg %p1012_p13  ;;  %s816_s23 = int_to_ptr.hbm [resolvable:$true] %s815_s23 }
  0x15   : > { %s817_s25 = scalar_lea.hbm %s816_s23, 64  ;;  %s822_s28 = scalar_lea.hbm %s1179_s0, 128 }
  0x16   : > { %p818_p2 = scmp.ne.s32.totalorder %s816_s23, %s817_s25  ;;  %p823_p5 = scmp.lt.s32.totalorder %s816_s23, %s1179_s0 }
  0x17   : > { %p824_p8 = scmp.lt.s32.totalorder %s822_s28, %s817_s25 }
  0x18   : > { %p820_p4 = pnand %p819_p3, %p818_p2 }
  0x19   : > { %p825_p10 = por %p824_p8, %p823_p5 }
  0x1a   : > { %p821_p7 = pneg %p820_p4 }
  0x1c   : > { %p826_p9 = pnand %p825_p10, %p821_p7 }
  0x1e   : > { %829 = shalt.err (!%p826_p9)
}
  0x1f   : > { %s913_s7 = smov 256   ;;  %s914_s11 = smov 16  }
  0x20   : > { %755 = dma.hbm_to_vmem [thread:$0]  (!%p1012_p13), %s199_s13, 1024, %s201_s15, %s188_s17, %s913_s7, %s913_s7, %s914_s11  }
  0x21   : > { %p209_p2 = pnand %p716_p0, %p208_p1 }
  0x22   : > { %s1033_s12 = sand.u32 (!%p209_p2), 1, %s903_s19  }
  0x23   : > { %212 = sbr.rel (%p209_p2) target bundleno = 663 (0x297), region = 40  ;;  %s717_s14 = sshll.u32 (!%p209_p2), %s1033_s12, 6 }
  0x24   : > { %s215_s23 = scalar_lea.sflag (!%p209_p2), [#allocation3], %s1033_s12  ;;  %s218_s25 = scalar_lea.vmem (!%p209_p2), [#allocation2], %s717_s14 }
  0x28   : > { %890 = dma.done.wait (%p990_p6), %s215_s23, 1024  }
  0x29   : > { %892 = vsyncadd (%p990_p6), %s215_s23, 4294966272  ;;  %v282_v0 = vlaneseq  ;;  %v1047_v2 = vld [vmem:[%s218_s25 + $0x20] sm:$0xff]  ;;  %v1049_v3 = vld [vmem:[%s218_s25 + $0x28] sm:$0xff]  ;;  %vm287_vm0 = vcmask 130112   ;;  %vm292_vm1 = vcmask 1041409   ;;  %vm294_vm2 = vcmask 130048  }
  0x2a   : > { %v1051_v4 = vld [vmem:[%s218_s25] sm:$0xff]  ;;  %v262_v5 = vadd.f32 %v1049_v3, %v1047_v2  ;;  %v1055_v6 = vld [vmem:[%s218_s25 + $0x8] sm:$0xff]  ;;  %v1059_v8 = vld [vmem:[%s218_s25 + $0x30] sm:$0xff]  ;;  %vm327_vm3 = vcmask 1043456   ;;  %vm323_vm4 = vcmask 31744   ;;  %s1123_s9 = scalar_lea.vmem [#allocation5], %s717_s14 }
  0x2b   : > { %v1043_v1 = vshrl.u32 %v282_v0, 7  ;;  %v256_v7 = vadd.f32 %v1055_v6, %v1051_v4  ;;  %v1061_v9 = vld [vmem:[%s218_s25 + $0x38] sm:$0xff]  ;;  %v1063_v10 = vld [vmem:[%s218_s25 + $0x10] sm:$0xff]  ;;  %v273_v14 = vld [vmem:[%s1180_s1 + $0x8] sm:$0xff]  ;;  %v283_v18 = vand.u32 127, %v282_v0  ;;  %s747_s14 = sshll.u32 %s968_s22, 6 }
  0x2c   : > { %263 = vadd.xlane.f32.xlu1 %v262_v5  ;;  %v1065_v11 = vld [vmem:[%s218_s25 + $0x18] sm:$0xff]  ;;  %v265_v12 = vadd.f32 %v1061_v9, %v1059_v8  ;;  %v272_v15 = vld [vmem:[%s1180_s1] sm:$0xff]  ;;  %311 = vmatpush.msra.mxu0 %v273_v14  ;;  %v728_v35 = vld [vmem:[%s1182_s3 + $0x8] sm:$0xf]  ;;  %s632_s11 = scalar_lea.hbm %s1184_s5, %s747_s14  ;;  %s633_s22 = sshll.u32 %s1123_s9, 4  ;;  %s634_s22 = int_to_ptr.vmem [resolvable:$true] %s633_s22 }
  0x2d   : > { %800 = vset.pattern.permute.xlu0 %v1043_v1  ;;  %798 = vset.pattern.permute.xlu2 %v1043_v1  ;;  %v259_v13 = vadd.f32 %v1065_v11, %v1063_v10  ;;  %v285_v20 = vadd.s32 4294967288, %v283_v18  ;;  %v318_v33 = vld [vmem:[%s1182_s3] sm:$0xf]  ;;  %v723_v34 = vld [vmem:[%s1182_s3 + $0x4] sm:$0xf]  ;;  %v1093_v41 = vadd.s32 8, %v1043_v1 }
  0x2e   : > { %257 = vadd.xlane.f32.xlu0 %v256_v7  ;;  %312 = vmatpush.msra.mxu0 %v272_v15  ;;  %v733_v36 = vld [vmem:[%s1182_s3 + $0xc] sm:$0xf]  ;;  %v810_v37 = vld [vmem:[%s1181_s2] ss:$0 sm:$0xff]  ;;  %v813_v46 = vld [vmem:[%s1183_s4 + $0x2] ss:$0 sm:$0xff] }
  0x2f   : > { %720 = vmatpush.msk.msra.mxu1 %vm327_vm3, %v318_v33  ;;  %725 = vmatpush.msk.msra.mxu2 %vm327_vm3, %v723_v34  ;;  %v811_v42 = vld [vmem:[%s1183_s4] ss:$0 sm:$0xff]  ;;  %v812_v61 = vld [vmem:[%s1183_s4 + $0x1] ss:$0 sm:$0xff]  ;;  %v814_v7 = vld [vmem:[%s1183_s4 + $0x3] ss:$0 sm:$0xff] }
  0x30   : > { %730 = vmatpush.msk.msra.mxu3 %vm327_vm3, %v728_v35  ;;  %801 = vset.pattern.permute.xlu1 %v1093_v41  ;;  %s635_s23 = sshll.u32 %s632_s11, 4  ;;  %s620_s25 = scalar_lea.sflag [#allocation4], %s1033_s12  ;;  %s636_s23 = int_to_ptr.hbm [resolvable:$true] %s635_s23 }
  0x31   : > { %735 = vmatpush.msk.msrb.mxu1 %vm327_vm3, %v733_v36  ;;  %s859_s29 = sshra.s32 %s636_s23, 4  ;;  %s865_s17 = scalar_lea.hbm %s1184_s5, 128  ;;  %s860_s29 = int_to_ptr.hbm [resolvable:$true] %s859_s29 }
  0x32   : > { %s861_s13 = scalar_lea.hbm %s860_s29, 64  ;;  %p866_p0 = scmp.lt.s32.totalorder %s860_s29, %s1184_s5 }
  0x33   : > { %p862_p6 = scmp.ne.s32.totalorder %s860_s29, %s861_s13  ;;  %p867_p1 = scmp.lt.s32.totalorder %s865_s17, %s861_s13 }
  0x34   : > { %266 = vadd.xlane.f32.xlu1 %v265_v12 }
  0x35   : > { %p863_p9 = pnand %p862_p6, %p997_p11  ;;  %p868_p3 = por %p867_p1, %p866_p0 }
  0x36   : > { %260 = vadd.xlane.f32.xlu0 %v259_v13 }
  0x37   : > { %p864_p13 = pneg %p863_p9 }
  0x39   : > { %p869_p4 = pnand %p868_p3, %p864_p13 }
  0x9f   : > { %v264_v16 = vpop.xlane.xlu1 %263 }
  0xa0   : > { %v270_v19 = vmul.f32 0.00390625, %v264_v16 }
  0xa1   : > { %v258_v17 = vpop.xlane.xlu0 %257 }
  0xa2   : > { %v268_v21 = vmul.f32 0.00390625, %v258_v17  ;;  %v289_v26 = vperm.slane %v270_v19, %v283_v18 }
  0xa4   : > { %v284_v28 = vperm.slane %v268_v21, %v283_v18 }
  0xa7   : > { %v267_v22 = vpop.xlane.xlu1 %266 }
  0xa8   : > { %v271_v23 = vmul.f32 0.00390625, %v267_v22 }
  0xa9   : > { %v261_v24 = vpop.xlane.xlu0 %260 }
  0xaa   : > { %v269_v25 = vmul.f32 0.00390625, %v261_v24  ;;  %v290_v27 = vperm.slane %v271_v23, %v285_v20 }
  0xac   : > { %v286_v29 = vperm.slane %v269_v25, %v285_v20  ;;  %v291_v30 = vsel %vm287_vm0, %v290_v27, %v289_v26 }
  0xae   : > { %v288_v31 = vsel %vm287_vm0, %v286_v29, %v284_v28 }
  0xaf   : > { %v293_v32 = vsel %vm292_vm1, %v291_v30, %v288_v31 }
  0xb0   : > { %719 = vmatmul.msk.f32.vlgmr.msra.gmra.mxu0 %vm294_vm2, %v293_v32 }
 0x12d   : > { %v314_v38 = vpop.f32.mrf.mxu0 }
 0x12e   : > { %v315_v39 = vadd.f32 %v810_v37, %v314_v38 }
 0x130   : > { %v317_v40 = vmax.f32 %v315_v39, 0.0 }
 0x132   : > { %721 = vmatmul.msk.f32.vlgmr.msra.gmra.mxu1 %vm323_vm4, %v317_v40  ;;  %726 = vmatmul.msk.f32.vlgmr.msra.gmra.mxu2 %vm323_vm4, %v317_v40 }
 0x133   : > { %731 = vmatmul.msk.f32.vlgmr.msra.gmra.mxu3 %vm323_vm4, %v317_v40 }
 0x13a   : > { %736 = vmatmul.msk.f32.vlgmr.msrb.gmra.mxu1 %vm323_vm4, %v317_v40 }
 0x1af   : > { %v348_v43 = vpop.f32.mrf.mxu1 }
 0x1b0   : > { %v349_v44 = vadd.f32 %v811_v42, %v348_v43 }
 0x1b2   : > { %v351_v45 = vadd.f32 3.0, %v349_v44 }
 0x1b4   : > { %v352_v47 = vmax.f32 %v351_v45, 0.0 }
 0x1b5   : > { %v385_v62 = vpop.f32.mrf.mxu2 }
 0x1b6   : > { %v353_v48 = vmin.f32 %v352_v47, 6.0  ;;  %v421_v49 = vpop.f32.mrf.mxu3  ;;  %v386_v0 = vadd.f32 %v812_v61, %v385_v62 }
 0x1b7   : > { %v422_v50 = vadd.f32 %v813_v46, %v421_v49  ;;  %v458_v13 = vpop.f32.mrf.mxu1 }
 0x1b8   : > { %v354_v51 = vmul.f32 0.16666667, %v353_v48  ;;  %v388_v12 = vadd.f32 3.0, %v386_v0  ;;  %v459_v14 = vadd.f32 %v814_v7, %v458_v13 }
 0x1b9   : > { %v424_v52 = vadd.f32 3.0, %v422_v50 }
 0x1ba   : > { %v722_v53 = vadd.f32 -0.5, %v354_v51  ;;  %v389_v17 = vmax.f32 %v388_v12, 0.0  ;;  %v461_v18 = vadd.f32 3.0, %v459_v14 }
 0x1bb   : > { %v425_v55 = vmax.f32 %v424_v52, 0.0 }
 0x1bc   : > { %v356_v54 = vmul.f32 2.0, %v722_v53  ;;  %v390_v19 = vmin.f32 %v389_v17, 6.0  ;;  %v462_v20 = vmax.f32 %v461_v18, 0.0 }
 0x1bd   : > { %v426_v57 = vmin.f32 %v425_v55, 6.0 }
 0x1be   : > { %v357_v56 = vadd.f32 1.0, %v356_v54  ;;  %v391_v21 = vmul.f32 0.16666667, %v390_v19  ;;  %v463_v22 = vmin.f32 %v462_v20, 6.0 }
 0x1bf   : > { %v427_v60 = vmul.f32 0.16666667, %v426_v57 }
 0x1c0   : > { %v480_v58 = vperm.slane %v357_v56, 1  ;;  %v467_v59 = vperm.slane %v357_v56, 0  ;;  %v727_v23 = vadd.f32 -0.5, %v391_v21  ;;  %v464_v24 = vmul.f32 0.16666667, %v463_v22 }
 0x1c1   : > { %v732_v63 = vadd.f32 -0.5, %v427_v60 }
 0x1c2   : > { %491 = vperm.xlu1 %801, %v480_v58   ;;  %485 = vperm.xlu0 %800, %v480_v58   ;;  %v493_v25 = vperm.slane %v727_v23, 0  ;;  %v737_v26 = vadd.f32 -0.5, %v464_v24  ;;  %v506_v29 = vperm.slane %v727_v23, 1 }
 0x1c3   : > { %472 = vperm.xlu2 %798, %v467_v59   ;;  %v429_v5 = vmul.f32 2.0, %v732_v63 }
 0x1c4   : > { %v545_v27 = vperm.slane %v737_v26, 0  ;;  %v558_v28 = vperm.slane %v737_v26, 1 }
 0x1c5   : > { %v519_v15 = vperm.slane %v429_v5, 0  ;;  %v532_v16 = vperm.slane %v429_v5, 1 }
 0x1ca   : > { %806 = vset.pattern.permute.xlu1 %v1043_v1  ;;  %807 = vset.pattern.permute.xlu0 %v1093_v41 }
 0x1cb   : > { %799 = vset.pattern.permute.xlu2 %v1093_v41 }
 0x1d2   : > { %524 = vperm.xlu1 %806, %v519_v15   ;;  %543 = vperm.xlu0 %807, %v532_v16  }
 0x1d3   : > { %478 = vperm.xlu2 %799, %v467_v59  }
 0x1da   : > { %537 = vperm.xlu1 %806, %v532_v16  }
 0x1db   : > { %802 = vset.pattern.permute.xlu2 %v1043_v1 }
 0x1e2   : > { %809 = vset.pattern.permute.xlu1 %v1093_v41 }
 0x1e3   : > { %498 = vperm.xlu2 %802, %v493_v25  }
 0x1ea   : > { %556 = vperm.xlu1 %809, %v545_v27  }
 0x1eb   : > { %803 = vset.pattern.permute.xlu2 %v1093_v41 }
 0x1f2   : > { %569 = vperm.xlu1 %809, %v558_v28  }
 0x1f3   : > { %504 = vperm.xlu2 %803, %v493_v25  }
 0x1fb   : > { %804 = vset.pattern.permute.xlu2 %v1043_v1 }
 0x203   : > { %511 = vperm.xlu2 %804, %v506_v29  }
 0x20b   : > { %805 = vset.pattern.permute.xlu2 %v1093_v41 }
 0x213   : > { %517 = vperm.xlu2 %805, %v506_v29  }
 0x21b   : > { %530 = vperm.xlu2 %805, %v519_v15  }
 0x21d   : > { %v473_v30 = vpop.permute.xlu2 %472 }
 0x21e   : > { %v571_v61 = vmul.f32 %v473_v30, %v1051_v4  ;;  %v572_v62 = vmul.f32 %v473_v30, %v1055_v6 }
 0x223   : > { %808 = vset.pattern.permute.xlu2 %v1043_v1 }
 0x22b   : > { %550 = vperm.xlu2 %808, %v545_v27  }
 0x22d   : > { %v479_v32 = vpop.permute.xlu2 %478 }
 0x233   : > { %563 = vperm.xlu2 %808, %v558_v28  }
 0x234   : > { %v492_v31 = vpop.permute.xlu1 %491  ;;  %v486_v37 = vpop.permute.xlu0 %485 }
 0x235   : > { %v577_v41 = vmul.f32 %v492_v31, %v1059_v8  ;;  %v578_v43 = vmul.f32 %v492_v31, %v1061_v9 }
 0x23d   : > { %v499_v34 = vpop.permute.xlu2 %498 }
 0x23e   : > { %v579_v0 = vadd.f32 %v571_v61, %v499_v34  ;;  %v580_v5 = vadd.f32 %v572_v62, %v499_v34 }
 0x244   : > { %v525_v33 = vpop.permute.xlu1 %524  ;;  %v544_v40 = vpop.permute.xlu0 %543 }
 0x245   : > { %v593_v1 = vmul.f32 %v544_v40, %v1059_v8  ;;  %v594_v44 = vmul.f32 %v544_v40, %v1061_v9  ;;  %v573_v8 = vmul.f32 %v479_v32, %v1063_v10  ;;  %v574_v9 = vmul.f32 %v479_v32, %v1065_v11 }
 0x246   : > { %v587_v63 = vmul.f32 %v525_v33, %v1051_v4  ;;  %v575_v4 = vmul.f32 %v486_v37, %v1047_v2 }
 0x24c   : > { %v538_v35 = vpop.permute.xlu1 %537 }
 0x24d   : > { %v505_v36 = vpop.permute.xlu2 %504  ;;  %v591_v15 = vmul.f32 %v538_v35, %v1047_v2  ;;  %v592_v16 = vmul.f32 %v538_v35, %v1049_v3 }
 0x24e   : > { %v581_v55 = vadd.f32 %v573_v8, %v505_v36  ;;  %v582_v56 = vadd.f32 %v574_v9, %v505_v36 }
 0x25c   : > { %v557_v38 = vpop.permute.xlu1 %556 }
 0x25d   : > { %v512_v39 = vpop.permute.xlu2 %511 }
 0x25e   : > { %v583_v18 = vadd.f32 %v575_v4, %v512_v39 }
 0x264   : > { %v570_v42 = vpop.permute.xlu1 %569 }
 0x265   : > { %v601_v46 = vadd.f32 %v593_v1, %v570_v42  ;;  %v602_v47 = vadd.f32 %v594_v44, %v570_v42 }
 0x26d   : > { %v518_v45 = vpop.permute.xlu2 %517 }
 0x26e   : > { %v585_v48 = vadd.f32 %v577_v41, %v518_v45  ;;  %v586_v49 = vadd.f32 %v578_v43, %v518_v45 }
 0x270   : > { %v609_v50 = vmax.f32 %v585_v48, %v601_v46  ;;  %v610_v51 = vmax.f32 %v586_v49, %v602_v47 }
 0x272   : > { %617 = vst [vmem:[%s1123_s9 + $0x30] sm:$0xff] %v609_v50 }
 0x273   : > { %618 = vst [vmem:[%s1123_s9 + $0x38] sm:$0xff] %v610_v51 }
 0x275   : > { %v531_v52 = vpop.permute.xlu2 %530 }
 0x276   : > { %v589_v53 = vmul.f32 %v531_v52, %v1063_v10  ;;  %v590_v54 = vmul.f32 %v531_v52, %v1065_v11  ;;  %v588_v10 = vmul.f32 %v525_v33, %v1055_v6  ;;  %v576_v6 = vmul.f32 %v486_v37, %v1049_v3 }
 0x278   : > { %v597_v57 = vadd.f32 %v589_v53, %v557_v38  ;;  %v598_v58 = vadd.f32 %v590_v54, %v557_v38  ;;  %v584_v19 = vadd.f32 %v576_v6, %v512_v39 }
 0x27a   : > { %v605_v59 = vmax.f32 %v581_v55, %v597_v57  ;;  %v606_v60 = vmax.f32 %v582_v56, %v598_v58 }
 0x27c   : > { %613 = vst [vmem:[%s1123_s9 + $0x10] sm:$0xff] %v605_v59 }
 0x27d   : > { %614 = vst [vmem:[%s1123_s9 + $0x18] sm:$0xff] %v606_v60 }
 0x285   : > { %v551_v11 = vpop.permute.xlu2 %550 }
 0x286   : > { %v595_v7 = vadd.f32 %v587_v63, %v551_v11  ;;  %v596_v12 = vadd.f32 %v588_v10, %v551_v11 }
 0x288   : > { %v603_v13 = vmax.f32 %v579_v0, %v595_v7  ;;  %v604_v14 = vmax.f32 %v580_v5, %v596_v12 }
 0x28a   : > { %611 = vst [vmem:[%s1123_s9] sm:$0xff] %v603_v13 }
 0x28b   : > { %612 = vst [vmem:[%s1123_s9 + $0x8] sm:$0xff] %v604_v14 }
 0x28d   : > { %v564_v17 = vpop.permute.xlu2 %563 }
 0x28e   : > { %v599_v20 = vadd.f32 %v591_v15, %v564_v17  ;;  %v600_v21 = vadd.f32 %v592_v16, %v564_v17 }
 0x290   : > { %v607_v22 = vmax.f32 %v583_v18, %v599_v20  ;;  %v608_v23 = vmax.f32 %v584_v19, %v600_v21 }
 0x292   : > { %615 = vst [vmem:[%s1123_s9 + $0x20] sm:$0xff] %v607_v22 }
 0x293   : > { %616 = vst [vmem:[%s1123_s9 + $0x28] sm:$0xff] %v608_v23 }
 0x294   : > { %872 = shalt.err (!%p869_p4)
}
 0x295   : > { %s915_s12 = smov 256   ;;  %s916_s28 = smov 16  }
 0x296   : > { %750 = dma.vmem_to_hbm [thread:$0]  (%p997_p11), %s634_s22, 1024, %s636_s23, %s620_s25, %s915_s12, %s915_s12, %s916_s28  }
 0x297 PF: > { %s650_s9 = sand.u32 1, %s899_s18   ;;  %p1190_p7 = scmp.ge.s32.totalorder %s911_s21, 2 }
 0x298   : > { %s651_s14 = scalar_lea.sflag [#allocation4], %s650_s9 }
 0x299   : > { %p757_p5 = pnand %p1190_p7, %p1001_p12 }
 0x29b   : > { %p758_p8 = pneg %p757_p5 }
 0x29d   : > { %894 = dma.done.wait (%p758_p8), %s651_s14, 1024  }
 0x29e   : > { %896 = vsyncadd (%p758_p8), %s651_s14, 4294966272  ;;  %p18_p10 = scmp.ge.s32.totalorder %s972_s24, 4   ;;  %s1191_s18 = smov %s903_s19 }
 0x29f   : > { %s1192_s19 = smov %s907_s20  ;;  %s1193_s20 = smov %s984_s27 }
 0x2a0   : > { %s1194_s21 = smov %s972_s24  ;;  %20 = sbr.rel (!%p18_p10) target bundleno = 5 (0x5), region = 91 }
 0x2a5   :  { %657 = vsyncpa [#allocation3], 1 }
 0x2a6   :  { %659 = vsyncpa [#allocation3 + $0x1], 1 }
 0x2a7   :  { %660 = vsyncpa [#allocation4], 1 }
 0x2a8   :  { %662 = vsyncpa [#allocation4 + $0x1], 1 }

</bundles_post_ra>
